<compile_context>
chip_gen: v5e
topology: v5e:2x2
jax: 0.10.0
libtpu: 0.0.40
codegen_flags: <defaults>
</compile_context>

<pallas_src>
import functools

import jax
import jax.numpy as jnp
from jax.experimental import pallas as pl
from jax.experimental.pallas import tpu as pltpu

IN_DIM = 28 * 28          # 784 (kept unpadded; full-dim block)
HIDDEN1 = 256
HIDDEN2 = 128
OUT_DIM = 10
OUT_PAD = 128             # lane-dense output columns
DEFAULT_TB = 512          # batch rows per grid step (multiple of 8)


def mlp_kernel(x_ref, w1_ref, b1_ref, w2_ref, b2_ref, w3_ref, b3_ref, o_ref):
    # x arrives as f32 straight from HBM; cast to bf16 on-chip for the MXU.
    x = x_ref[...].astype(w1_ref.dtype)
    # layer1: Linear + ReLU  (bf16 MXU matmul, f32 accumulate + f32 epilogue)
    h1 = jnp.dot(x, w1_ref[...], preferred_element_type=jnp.float32)
    h1 = jnp.maximum(h1 + b1_ref[...], 0.0)
    # layer2: Linear + ReLU
    h2 = jnp.dot(h1.astype(w2_ref.dtype), w2_ref[...],
                 preferred_element_type=jnp.float32)
    h2 = jnp.maximum(h2 + b2_ref[...], 0.0)
    # layer3: Linear (output lane-padded to 128 columns)
    out = jnp.dot(h2.astype(w3_ref.dtype), w3_ref[...],
                  preferred_element_type=jnp.float32)
    o_ref[...] = (out + b3_ref[...]).astype(o_ref.dtype)


@functools.partial(jax.jit, static_argnames=("tb",))
def mynet_forward(x_nchw, params, *, tb=DEFAULT_TB):
    w1, b1, w2, b2, w3, b3 = params
    B = x_nchw.shape[0]
    x2d = x_nchw.reshape(B, IN_DIM)            # x.view(-1, 28*28): metadata-only

    compute_dtype = jnp.bfloat16

    # Weights -> bf16 (tiny one-time casts; halves VMEM residency + MXU-native).
    # Biases stay f32 for the f32 epilogue.  Final layer lane-padded 10 -> 128.
    w1c = w1.astype(compute_dtype)
    w2c = w2.astype(compute_dtype)
    w3p = jnp.pad(w3, ((0, 0), (0, OUT_PAD - OUT_DIM))).astype(compute_dtype)
    b1f = b1.astype(jnp.float32)
    b2f = b2.astype(jnp.float32)
    b3f = jnp.pad(b3, ((0, 0), (0, OUT_PAD - OUT_DIM))).astype(jnp.float32)

    # Batch tiling: no padding copy of x.  If B fits in one tile, use a single
    # full-array block; otherwise tile with `tb` rows (multiple of 8) and let
    # Pallas mask the partial last block (rows are independent).
    tb_eff = tb if B > tb else B
    grid = (pl.cdiv(B, tb_eff),)

    flops = 2 * B * (IN_DIM * HIDDEN1 + HIDDEN1 * HIDDEN2 + HIDDEN2 * OUT_PAD)
    bytes_accessed = (
        B * IN_DIM * 4                                                     # x (f32)
        + (IN_DIM * HIDDEN1 + HIDDEN1 * HIDDEN2 + HIDDEN2 * OUT_PAD) * 2   # weights (bf16)
        + (HIDDEN1 + HIDDEN2 + OUT_PAD) * 4                                # biases (f32)
        + B * OUT_PAD * 4                                                  # output (f32)
    )

    out = pl.pallas_call(
        mlp_kernel,
        out_shape=jax.ShapeDtypeStruct((B, OUT_PAD), jnp.float32),
        grid=grid,
        in_specs=[
            pl.BlockSpec((tb_eff, IN_DIM), lambda i: (i, 0)),     # x tile (f32)
            pl.BlockSpec((IN_DIM, HIDDEN1), lambda i: (0, 0)),    # w1 (VMEM-resident)
            pl.BlockSpec((1, HIDDEN1), lambda i: (0, 0)),         # b1
            pl.BlockSpec((HIDDEN1, HIDDEN2), lambda i: (0, 0)),   # w2
            pl.BlockSpec((1, HIDDEN2), lambda i: (0, 0)),         # b2
            pl.BlockSpec((HIDDEN2, OUT_PAD), lambda i: (0, 0)),   # w3 (padded)
            pl.BlockSpec((1, OUT_PAD), lambda i: (0, 0)),         # b3 (padded)
        ],
        out_specs=pl.BlockSpec((tb_eff, OUT_PAD), lambda i: (i, 0)),
        compiler_params=pltpu.CompilerParams(
            dimension_semantics=("parallel",),
            vmem_limit_bytes=32 << 20,
        ),
        cost_estimate=pl.CostEstimate(
            flops=flops, transcendentals=0, bytes_accessed=bytes_accessed),
    )(x2d, w1c, b1f, w2c, b2f, w3p, b3f)

    # Drop the lane padding of the final layer.
    return out[:, :OUT_DIM]


def init_params(key):
    # Deterministic init mimicking PyTorch nn.Linear default:
    # U(-1/sqrt(fan_in), 1/sqrt(fan_in)).
    ks = jax.random.split(key, 6)

    def uniform(k, shape, fan_in):
        bound = 1.0 / jnp.sqrt(fan_in)
        return jax.random.uniform(k, shape, jnp.float32, -bound, bound)

    w1 = uniform(ks[0], (IN_DIM, HIDDEN1), IN_DIM)
    b1 = uniform(ks[1], (1, HIDDEN1), IN_DIM)
    w2 = uniform(ks[2], (HIDDEN1, HIDDEN2), HIDDEN1)
    b2 = uniform(ks[3], (1, HIDDEN2), HIDDEN1)
    w3 = uniform(ks[4], (HIDDEN2, OUT_DIM), HIDDEN2)
    b3 = uniform(ks[5], (1, OUT_DIM), HIDDEN2)
    return (w1, b1, w2, b2, w3, b3)


def reference_forward(x_nchw, params, compute_dtype=jnp.bfloat16):
    # Same bf16-matmul / f32-accumulate numerics as the kernel.
    w1, b1, w2, b2, w3, b3 = params
    x = x_nchw.reshape(x_nchw.shape[0], IN_DIM).astype(compute_dtype)
    h1 = jnp.dot(x, w1.astype(compute_dtype),
                 preferred_element_type=jnp.float32) + b1
    h1 = jnp.maximum(h1, 0.0)
    h2 = jnp.dot(h1.astype(compute_dtype), w2.astype(compute_dtype),
                 preferred_element_type=jnp.float32) + b2
    h2 = jnp.maximum(h2, 0.0)
    return jnp.dot(h2.astype(compute_dtype), w3.astype(compute_dtype),
                   preferred_element_type=jnp.float32) + b3


if __name__ == "__main__":
    key = jax.random.PRNGKey(0)
    k_x, k_p = jax.random.split(key)

    B = 2
    x = jax.random.normal(k_x, (B, 1, 28, 28), jnp.float32)  # NCHW, like MNIST
    params = init_params(k_p)

    out = mynet_forward(x, params)
    out = jax.block_until_ready(out)

    ref = reference_forward(x, params)
    assert out.shape == (B, OUT_DIM)
    assert jnp.allclose(out, ref, atol=1e-3, rtol=1e-3), "mismatch vs JAX reference"

    print("KERNEL_OK")
</pallas_src>

<mosaic_0001>
module attributes {stable_mosaic.version = 11 : i64} {
  func.func @mlp_kernel(%arg0: i32, %arg1: memref<2x784xf32, #tpu.memory_space<vmem>>, %arg2: memref<784x256xbf16, #tpu.memory_space<vmem>>, %arg3: memref<1x256xf32, #tpu.memory_space<vmem>>, %arg4: memref<256x128xbf16, #tpu.memory_space<vmem>>, %arg5: memref<1x128xf32, #tpu.memory_space<vmem>>, %arg6: memref<128x128xbf16, #tpu.memory_space<vmem>>, %arg7: memref<1x128xf32, #tpu.memory_space<vmem>>, %arg8: memref<2x128xf32, #tpu.memory_space<vmem>>) attributes {dimension_semantics = [#tpu.dimension_semantics<parallel>], iteration_bounds = array<i64: 1>, scalar_prefetch = 0 : i64, scratch_operands = 0 : i64, tpu.core_type = #tpu.core_type<tc>, window_params = [{transform_indices = @transform_0, window_bounds = array<i64: 2, 784>}, {pipeline_mode = #tpu.pipeline_mode<synchronous>, transform_indices = @transform_1, window_bounds = array<i64: 784, 256>}, {pipeline_mode = #tpu.pipeline_mode<synchronous>, transform_indices = @transform_2, window_bounds = array<i64: 1, 256>}, {pipeline_mode = #tpu.pipeline_mode<synchronous>, transform_indices = @transform_3, window_bounds = array<i64: 256, 128>}, {pipeline_mode = #tpu.pipeline_mode<synchronous>, transform_indices = @transform_4, window_bounds = array<i64: 1, 128>}, {pipeline_mode = #tpu.pipeline_mode<synchronous>, transform_indices = @transform_5, window_bounds = array<i64: 128, 128>}, {pipeline_mode = #tpu.pipeline_mode<synchronous>, transform_indices = @transform_6, window_bounds = array<i64: 1, 128>}, {transform_indices = @transform_7, window_bounds = array<i64: 2, 128>}]} {
    %c0 = arith.constant 0 : index
    %c0_0 = arith.constant 0 : index
    %0 = vector.load %arg1[%c0, %c0_0] : memref<2x784xf32, #tpu.memory_space<vmem>>, vector<2x784xf32>
    %1 = arith.truncf %0 : vector<2x784xf32> to vector<2x784xbf16>
    %c0_1 = arith.constant 0 : index
    %c0_2 = arith.constant 0 : index
    %2 = vector.load %arg2[%c0_1, %c0_2] : memref<784x256xbf16, #tpu.memory_space<vmem>>, vector<784x256xbf16>
    %cst = arith.constant dense<0.000000e+00> : vector<2x256xf32>
    %3 = tpu.matmul %1, %2, %cst {dimension_numbers = #tpu.dot_dimension_numbers<[1], [0], [0], [1], [0, 0, 1, 1], [], []>} : vector<2x784xbf16>, vector<784x256xbf16>, vector<2x256xf32> -> vector<2x256xf32>
    %c0_3 = arith.constant 0 : index
    %c0_4 = arith.constant 0 : index
    %4 = vector.load %arg3[%c0_3, %c0_4] : memref<1x256xf32, #tpu.memory_space<vmem>>, vector<1x256xf32>
    %5 = vector.broadcast %4 : vector<1x256xf32> to vector<2x256xf32>
    %6 = arith.addf %3, %5 : vector<2x256xf32>
    %cst_5 = arith.constant 0.000000e+00 : f32
    %7 = vector.broadcast %cst_5 : f32 to vector<2x256xf32>
    %8 = arith.maximumf %6, %7 : vector<2x256xf32>
    %9 = arith.truncf %8 : vector<2x256xf32> to vector<2x256xbf16>
    %c0_6 = arith.constant 0 : index
    %c0_7 = arith.constant 0 : index
    %10 = vector.load %arg4[%c0_6, %c0_7] : memref<256x128xbf16, #tpu.memory_space<vmem>>, vector<256x128xbf16>
    %cst_8 = arith.constant dense<0.000000e+00> : vector<2x128xf32>
    %11 = tpu.matmul %9, %10, %cst_8 {dimension_numbers = #tpu.dot_dimension_numbers<[1], [0], [0], [1], [0, 0, 1, 1], [], []>} : vector<2x256xbf16>, vector<256x128xbf16>, vector<2x128xf32> -> vector<2x128xf32>
    %c0_9 = arith.constant 0 : index
    %c0_10 = arith.constant 0 : index
    %12 = vector.load %arg5[%c0_9, %c0_10] : memref<1x128xf32, #tpu.memory_space<vmem>>, vector<1x128xf32>
    %13 = vector.broadcast %12 : vector<1x128xf32> to vector<2x128xf32>
    %14 = arith.addf %11, %13 : vector<2x128xf32>
    %cst_11 = arith.constant 0.000000e+00 : f32
    %15 = vector.broadcast %cst_11 : f32 to vector<2x128xf32>
    %16 = arith.maximumf %14, %15 : vector<2x128xf32>
    %17 = arith.truncf %16 : vector<2x128xf32> to vector<2x128xbf16>
    %c0_12 = arith.constant 0 : index
    %c0_13 = arith.constant 0 : index
    %18 = vector.load %arg6[%c0_12, %c0_13] : memref<128x128xbf16, #tpu.memory_space<vmem>>, vector<128x128xbf16>
    %cst_14 = arith.constant dense<0.000000e+00> : vector<2x128xf32>
    %19 = tpu.matmul %17, %18, %cst_14 {dimension_numbers = #tpu.dot_dimension_numbers<[1], [0], [0], [1], [0, 0, 1, 1], [], []>} : vector<2x128xbf16>, vector<128x128xbf16>, vector<2x128xf32> -> vector<2x128xf32>
    %c0_15 = arith.constant 0 : index
    %c0_16 = arith.constant 0 : index
    %20 = vector.load %arg7[%c0_15, %c0_16] : memref<1x128xf32, #tpu.memory_space<vmem>>, vector<1x128xf32>
    %21 = vector.broadcast %20 : vector<1x128xf32> to vector<2x128xf32>
    %22 = arith.addf %19, %21 : vector<2x128xf32>
    %c0_17 = arith.constant 0 : index
    %c0_18 = arith.constant 0 : index
    %23 = vector.load %arg8[%c0_17, %c0_18] : memref<2x128xf32, #tpu.memory_space<vmem>>, vector<2x128xf32>
    tpu.vector_store %arg8[%c0_17, %c0_18], %22 {strides = array<i32>} : memref<2x128xf32, #tpu.memory_space<vmem>>, vector<2x128xf32>,
    return
  }
  func.func @transform_0(%arg0: i32) -> (i32, i32) {
    %c0_i32 = arith.constant 0 : i32
    %c0_i32_0 = arith.constant 0 : i32
    return %arg0, %c0_i32 : i32, i32
  }
  func.func @transform_1(%arg0: i32) -> (i32, i32) {
    %c0_i32 = arith.constant 0 : i32
    %c0_i32_0 = arith.constant 0 : i32
    %c0_i32_1 = arith.constant 0 : i32
    return %c0_i32, %c0_i32_0 : i32, i32
  }
  func.func @transform_2(%arg0: i32) -> (i32, i32) {
    %c0_i32 = arith.constant 0 : i32
    %c0_i32_0 = arith.constant 0 : i32
    %c0_i32_1 = arith.constant 0 : i32
    return %c0_i32, %c0_i32_0 : i32, i32
  }
  func.func @transform_3(%arg0: i32) -> (i32, i32) {
    %c0_i32 = arith.constant 0 : i32
    %c0_i32_0 = arith.constant 0 : i32
    %c0_i32_1 = arith.constant 0 : i32
    return %c0_i32, %c0_i32_0 : i32, i32
  }
  func.func @transform_4(%arg0: i32) -> (i32, i32) {
    %c0_i32 = arith.constant 0 : i32
    %c0_i32_0 = arith.constant 0 : i32
    %c0_i32_1 = arith.constant 0 : i32
    return %c0_i32, %c0_i32_0 : i32, i32
  }
  func.func @transform_5(%arg0: i32) -> (i32, i32) {
    %c0_i32 = arith.constant 0 : i32
    %c0_i32_0 = arith.constant 0 : i32
    %c0_i32_1 = arith.constant 0 : i32
    return %c0_i32, %c0_i32_0 : i32, i32
  }
  func.func @transform_6(%arg0: i32) -> (i32, i32) {
    %c0_i32 = arith.constant 0 : i32
    %c0_i32_0 = arith.constant 0 : i32
    %c0_i32_1 = arith.constant 0 : i32
    return %c0_i32, %c0_i32_0 : i32, i32
  }
  func.func @transform_7(%arg0: i32) -> (i32, i32) {
    %c0_i32 = arith.constant 0 : i32
    %c0_i32_0 = arith.constant 0 : i32
    return %arg0, %c0_i32 : i32, i32
  }
}

</mosaic_0001>

<bundles_post_ra>
// kernel: mynet_forward.1
= control target key start
LH: loop header
LB: loop body
LE: loop exit
PB: predicated region body
PF: predicated region fallthrough
CT: control target
= control target key end

     0   :  { %vm650_vm0 = vcmask 130048   ;;  %s2488_s0 = inlined_call_operand.vmem [shape: f32[2,784], index: 0, kind: input, shape index: {}]   ;;  %s2489_s1 = inlined_call_operand.vmem [shape: bf16[784,256], index: 1, kind: input, shape index: {}]   ;;  %s2490_s2 = inlined_call_operand.vmem [shape: f32[1,256], index: 2, kind: input, shape index: {}]   ;;  %s2491_s3 = inlined_call_operand.vmem [shape: bf16[256,128], index: 3, kind: input, shape index: {}]   ;;  %s2492_s4 = inlined_call_operand.vmem [shape: f32[1,128], index: 4, kind: input, shape index: {}]   ;;  %s2493_s5 = inlined_call_operand.vmem [shape: bf16[128,128], index: 5, kind: input, shape index: {}]   ;;  %s2494_s6 = inlined_call_operand.vmem [shape: f32[1,128], index: 6, kind: input, shape index: {}]   ;;  %s2495_s7 = inlined_call_operand.hbm [shape: f32[2,128], index: 7, kind: output, shape index: {}]  }
   0x1   :  { %v1156_v0 = vld [vmem:[%s2489_s1 + $0x70] sm:$0xf]  ;;  %v1603_v1 = vld [vmem:[%s2489_s1 + $0x74] sm:$0xf0]  ;;  %v1148_v11 = vld [vmem:[%s2489_s1 + $0x60] sm:$0xf] }
   0x2   :  { %v1284_v2 = vld [vmem:[%s2489_s1 + $0x170] sm:$0xf]  ;;  %v1157_v3 = vor.u32 %v1603_v1, %v1156_v0  ;;  %v1635_v4 = vld [vmem:[%s2489_s1 + $0x174] sm:$0xf0]  ;;  %v1601_v13 = vld [vmem:[%s2489_s1 + $0x64] sm:$0xf0] }
   0x3   :  { %v1348_v5 = vld [vmem:[%s2489_s1 + $0x1f0] sm:$0xf]  ;;  %v1651_v6 = vld [vmem:[%s2489_s1 + $0x1f4] sm:$0xf0]  ;;  %v1285_v7 = vor.u32 %v1635_v4, %v1284_v2  ;;  %v1276_v14 = vld [vmem:[%s2489_s1 + $0x160] sm:$0xf]  ;;  %v1149_v16 = vor.u32 %v1601_v13, %v1148_v11 }
   0x4   :  { %v1349_v8 = vor.u32 %v1651_v6, %v1348_v5  ;;  %v1220_v9 = vld [vmem:[%s2489_s1 + $0xf0] sm:$0xf]  ;;  %v1619_v10 = vld [vmem:[%s2489_s1 + $0xf4] sm:$0xf0]  ;;  %654 = vmatpush.bf16.msra.mxu0 %v1157_v3  ;;  %v1633_v15 = vld [vmem:[%s2489_s1 + $0x164] sm:$0xf0] }
   0x5   :  { %v1221_v12 = vor.u32 %v1619_v10, %v1220_v9  ;;  %680 = vmatpush.bf16.msra.mxu2 %v1285_v7  ;;  %v1277_v17 = vor.u32 %v1633_v15, %v1276_v14  ;;  %v1340_v18 = vld [vmem:[%s2489_s1 + $0x1e0] sm:$0xf]  ;;  %v1649_v19 = vld [vmem:[%s2489_s1 + $0x1e4] sm:$0xf0]  ;;  %v1140_v23 = vld [vmem:[%s2489_s1 + $0x50] sm:$0xf] }
   0x6   :  { %693 = vmatpush.bf16.msra.mxu3 %v1349_v8  ;;  %v1212_v20 = vld [vmem:[%s2489_s1 + $0xe0] sm:$0xf]  ;;  %v1341_v21 = vor.u32 %v1649_v19, %v1340_v18  ;;  %v1617_v22 = vld [vmem:[%s2489_s1 + $0xe4] sm:$0xf0]  ;;  %v1599_v24 = vld [vmem:[%s2489_s1 + $0x54] sm:$0xf0] }
   0x7   :  { %667 = vmatpush.bf16.msra.mxu1 %v1221_v12  ;;  %v1213_v25 = vor.u32 %v1617_v22, %v1212_v20  ;;  %v1268_v26 = vld [vmem:[%s2489_s1 + $0x150] sm:$0xf]  ;;  %v1631_v27 = vld [vmem:[%s2489_s1 + $0x154] sm:$0xf0]  ;;  %v1141_v29 = vor.u32 %v1599_v24, %v1140_v23  ;;  %v1132_v35 = vld [vmem:[%s2489_s1 + $0x40] sm:$0xf] }
   0x8   :  { %v1332_v28 = vld [vmem:[%s2489_s1 + $0x1d0] sm:$0xf]  ;;  %655 = vmatpush.bf16.msra.mxu0 %v1149_v16  ;;  %v1647_v30 = vld [vmem:[%s2489_s1 + $0x1d4] sm:$0xf0]  ;;  %v1269_v33 = vor.u32 %v1631_v27, %v1268_v26  ;;  %v1597_v36 = vld [vmem:[%s2489_s1 + $0x44] sm:$0xf0] }
   0x9   :  { %v1204_v31 = vld [vmem:[%s2489_s1 + $0xd0] sm:$0xf]  ;;  %v1615_v32 = vld [vmem:[%s2489_s1 + $0xd4] sm:$0xf0]  ;;  %681 = vmatpush.bf16.msra.mxu2 %v1277_v17  ;;  %v1333_v34 = vor.u32 %v1647_v30, %v1332_v28  ;;  %v1260_v37 = vld [vmem:[%s2489_s1 + $0x140] sm:$0xf]  ;;  %v1133_v44 = vor.u32 %v1597_v36, %v1132_v35 }
   0xa   :  { %694 = vmatpush.bf16.msra.mxu3 %v1341_v21  ;;  %v1205_v38 = vor.u32 %v1615_v32, %v1204_v31  ;;  %v1629_v39 = vld [vmem:[%s2489_s1 + $0x144] sm:$0xf0]  ;;  %v1324_v40 = vld [vmem:[%s2489_s1 + $0x1c0] sm:$0xf]  ;;  %v1124_v47 = vld [vmem:[%s2489_s1 + $0x30] sm:$0xf] }
   0xb   :  { %668 = vmatpush.bf16.msra.mxu1 %v1213_v25  ;;  %v1645_v41 = vld [vmem:[%s2489_s1 + $0x1c4] sm:$0xf0]  ;;  %v1196_v42 = vld [vmem:[%s2489_s1 + $0xc0] sm:$0xf]  ;;  %v1261_v45 = vor.u32 %v1629_v39, %v1260_v37  ;;  %v1595_v48 = vld [vmem:[%s2489_s1 + $0x34] sm:$0xf0] }
   0xc   :  { %v1613_v43 = vld [vmem:[%s2489_s1 + $0xc4] sm:$0xf0]  ;;  %656 = vmatpush.bf16.msra.mxu0 %v1141_v29  ;;  %v1325_v46 = vor.u32 %v1645_v41, %v1324_v40  ;;  %v1252_v49 = vld [vmem:[%s2489_s1 + $0x130] sm:$0xf]  ;;  %v1627_v51 = vld [vmem:[%s2489_s1 + $0x134] sm:$0xf0]  ;;  %v1125_v56 = vor.u32 %v1595_v48, %v1124_v47 }
   0xd   :  { %682 = vmatpush.bf16.msra.mxu2 %v1269_v33  ;;  %v1197_v50 = vor.u32 %v1613_v43, %v1196_v42  ;;  %v1316_v52 = vld [vmem:[%s2489_s1 + $0x1b0] sm:$0xf]  ;;  %v1643_v53 = vld [vmem:[%s2489_s1 + $0x1b4] sm:$0xf0]  ;;  %v1253_v57 = vor.u32 %v1627_v51, %v1252_v49  ;;  %v1116_v59 = vld [vmem:[%s2489_s1 + $0x20] sm:$0xf] }
   0xe   :  { %695 = vmatpush.bf16.msra.mxu3 %v1333_v34  ;;  %v1188_v54 = vld [vmem:[%s2489_s1 + $0xb0] sm:$0xf]  ;;  %v1611_v55 = vld [vmem:[%s2489_s1 + $0xb4] sm:$0xf0]  ;;  %v1317_v58 = vor.u32 %v1643_v53, %v1316_v52  ;;  %v1593_v60 = vld [vmem:[%s2489_s1 + $0x24] sm:$0xf0] }
   0xf   :  { %669 = vmatpush.bf16.msra.mxu1 %v1205_v38  ;;  %v1244_v61 = vld [vmem:[%s2489_s1 + $0x120] sm:$0xf]  ;;  %v1189_v62 = vor.u32 %v1611_v55, %v1188_v54  ;;  %v1625_v63 = vld [vmem:[%s2489_s1 + $0x124] sm:$0xf0]  ;;  %v1117_v4 = vor.u32 %v1593_v60, %v1116_v59  ;;  %v1108_v5 = vld [vmem:[%s2489_s1 + $0x10] sm:$0xf] }
  0x10   :  { %657 = vmatpush.bf16.msra.mxu0 %v1133_v44  ;;  %v1308_v0 = vld [vmem:[%s2489_s1 + $0x1a0] sm:$0xf]  ;;  %v1641_v1 = vld [vmem:[%s2489_s1 + $0x1a4] sm:$0xf0]  ;;  %v1591_v6 = vld [vmem:[%s2489_s1 + $0x14] sm:$0xf0]  ;;  %v1245_v7 = vor.u32 %v1625_v63, %v1244_v61 }
  0x11   :  { %683 = vmatpush.bf16.msra.mxu2 %v1261_v45  ;;  %v1180_v2 = vld [vmem:[%s2489_s1 + $0xa0] sm:$0xf]  ;;  %v1609_v3 = vld [vmem:[%s2489_s1 + $0xa4] sm:$0xf0]  ;;  %v1309_v8 = vor.u32 %v1641_v1, %v1308_v0  ;;  %v1236_v9 = vld [vmem:[%s2489_s1 + $0x110] sm:$0xf]  ;;  %v1109_v19 = vor.u32 %v1591_v6, %v1108_v5 }
  0x12   :  { %696 = vmatpush.bf16.msra.mxu3 %v1325_v46  ;;  %v1623_v10 = vld [vmem:[%s2489_s1 + $0x114] sm:$0xf0]  ;;  %v1300_v11 = vld [vmem:[%s2489_s1 + $0x190] sm:$0xf]  ;;  %v1181_v12 = vor.u32 %v1609_v3, %v1180_v2  ;;  %v1100_v16 = vld [vmem:[%s2489_s1] sm:$0xf] }
  0x13   :  { %670 = vmatpush.bf16.msra.mxu1 %v1197_v50  ;;  %v1639_v13 = vld [vmem:[%s2489_s1 + $0x194] sm:$0xf0]  ;;  %v1172_v14 = vld [vmem:[%s2489_s1 + $0x90] sm:$0xf]  ;;  %v1589_v17 = vld [vmem:[%s2489_s1 + $0x4] sm:$0xf0]  ;;  %v1237_v22 = vor.u32 %v1623_v10, %v1236_v9 }
  0x14   :  { %658 = vmatpush.bf16.msra.mxu0 %v1125_v56  ;;  %v1607_v15 = vld [vmem:[%s2489_s1 + $0x94] sm:$0xf0]  ;;  %v28_v18 = vld [vmem:[%s2488_s0] sm:$0xff]  ;;  %v1621_v21 = vld [vmem:[%s2489_s1 + $0x104] sm:$0xf0]  ;;  %v1301_v23 = vor.u32 %v1639_v13, %v1300_v11  ;;  %v1101_v34 = vor.u32 %v1589_v17, %v1100_v16 }
  0x15   :  { %684 = vmatpush.bf16.msra.mxu2 %v1253_v57  ;;  %v1228_v20 = vld [vmem:[%s2489_s1 + $0x100] sm:$0xf]  ;;  %32 = vst [vmem:[#allocation1] ss:$4 sm:$0xff] %v28_v18  ;;  %v1637_v25 = vld [vmem:[%s2489_s1 + $0x184] sm:$0xf0]  ;;  %v1173_v27 = vor.u32 %v1607_v15, %v1172_v14 }
  0x16   :  { %697 = vmatpush.bf16.msra.mxu3 %v1317_v58  ;;  %v1292_v24 = vld [vmem:[%s2489_s1 + $0x180] sm:$0xf]  ;;  %v1412_v26 = vld [vmem:[%s2489_s1 + $0x270] sm:$0xf]  ;;  %v1667_v28 = vld [vmem:[%s2489_s1 + $0x274] sm:$0xf0]  ;;  %v1229_v38 = vor.u32 %v1621_v21, %v1228_v20 }
  0x17   :  { %671 = vmatpush.bf16.msra.mxu1 %v1189_v62  ;;  %v1602_v29 = vld [vmem:[%s2489_s1 + $0x74] sm:$0xf]  ;;  %v1158_v30 = vld [vmem:[%s2489_s1 + $0x78] sm:$0xf0]  ;;  %v1164_v31 = vld [vmem:[%s2489_s1 + $0x80] sm:$0xf]  ;;  %v1293_v39 = vor.u32 %v1637_v25, %v1292_v24  ;;  %v1413_v43 = vor.u32 %v1667_v28, %v1412_v26 }
  0x18   :  { %659 = vmatpush.bf16.msra.mxu0 %v1117_v4  ;;  %v1605_v32 = vld [vmem:[%s2489_s1 + $0x84] sm:$0xf0]  ;;  %v1476_v33 = vld [vmem:[%s2489_s1 + $0x2f0] sm:$0xf]  ;;  %v1683_v35 = vld [vmem:[%s2489_s1 + $0x2f4] sm:$0xf0]  ;;  %v1161_v44 = vor.u32 %v1602_v29, %v1158_v30 }
  0x19   :  { %685 = vmatpush.bf16.msra.mxu2 %v1245_v7  ;;  %v1484_v36 = vld [vmem:[%s2489_s1 + $0x300] sm:$0xf]  ;;  %v1685_v37 = vld [vmem:[%s2489_s1 + $0x304] sm:$0xf0]  ;;  %v1618_v40 = vld [vmem:[%s2489_s1 + $0xf4] sm:$0xf]  ;;  %v1165_v48 = vor.u32 %v1605_v32, %v1164_v31  ;;  %v1477_v53 = vor.u32 %v1683_v35, %v1476_v33 }
  0x1a   :  { %698 = vmatpush.bf16.msra.mxu3 %v1309_v8  ;;  %v1222_v41 = vld [vmem:[%s2489_s1 + $0xf8] sm:$0xf0]  ;;  %v1404_v42 = vld [vmem:[%s2489_s1 + $0x260] sm:$0xf]  ;;  %v1665_v45 = vld [vmem:[%s2489_s1 + $0x264] sm:$0xf0]  ;;  %v1485_v50 = vor.u32 %v1685_v37, %v1484_v36 }
  0x1b   :  { %672 = vmatpush.bf16.msra.mxu1 %v1181_v12  ;;  %v1600_v46 = vld [vmem:[%s2489_s1 + $0x64] sm:$0xf]  ;;  %v1150_v47 = vld [vmem:[%s2489_s1 + $0x68] sm:$0xf0]  ;;  %v1225_v56 = vor.u32 %v1618_v40, %v1222_v41  ;;  %v1468_v58 = vld [vmem:[%s2489_s1 + $0x2e0] sm:$0xf]  ;;  %v1405_v60 = vor.u32 %v1665_v45, %v1404_v42 }
  0x1c   :  { %660 = vmatpush.bf16.msra.mxu0 %v1109_v19  ;;  %v37_v49 = vld.sshfl [vmem:[#allocation1 + $0x10] sm:$0xff pattern:$0x73625140]  ;;  %v35_v51 = vld.sshfl [vmem:[#allocation1] sm:$0xff pattern:$0x73625140]  ;;  %v1153_v61 = vor.u32 %v1600_v46, %v1150_v47 }
  0x1d   :  { %686 = vmatpush.bf16.msra.mxu2 %v1237_v22  ;;  %v2017_v52 = vpack.c.bf16 %v37_v49, %v37_v49  ;;  %v38_v54 = vld.sshfl [vmem:[#allocation1 + $0x18] sm:$0xff pattern:$0x73625140]  ;;  %v36_v55 = vld.sshfl [vmem:[#allocation1 + $0x8] sm:$0xff pattern:$0x73625140]  ;;  %v2019_v57 = vpack.c.bf16 %v35_v51, %v35_v51 }
  0x1e   :  { %699 = vmatpush.bf16.msra.mxu3 %v1301_v23  ;;  %v1681_v59 = vld [vmem:[%s2489_s1 + $0x2e4] sm:$0xf0]  ;;  %v1616_v62 = vld [vmem:[%s2489_s1 + $0xe4] sm:$0xf]  ;;  %v1214_v63 = vld [vmem:[%s2489_s1 + $0xe8] sm:$0xf0]  ;;  %v2036_v1 = vpack.c.bf16 %v38_v54, %v38_v54  ;;  %v2038_v2 = vpack.c.bf16 %v36_v55, %v36_v55 }
  0x1f   :  { %673 = vmatpush.bf16.msra.mxu1 %v1173_v27  ;;  %v1396_v0 = vld [vmem:[%s2489_s1 + $0x250] sm:$0xf]  ;;  %v1663_v3 = vld [vmem:[%s2489_s1 + $0x254] sm:$0xf0]  ;;  %v1598_v4 = vld [vmem:[%s2489_s1 + $0x54] sm:$0xf]  ;;  %v1469_v6 = vor.u32 %v1681_v59, %v1468_v58  ;;  %v1217_v7 = vor.u32 %v1616_v62, %v1214_v63 }
  0x20   :  { %661 = vmatpush.bf16.msra.mxu0 %v1101_v34  ;;  %v1142_v5 = vld [vmem:[%s2489_s1 + $0x58] sm:$0xf0]  ;;  %v1460_v8 = vld [vmem:[%s2489_s1 + $0x2d0] sm:$0xf]  ;;  %v1679_v9 = vld [vmem:[%s2489_s1 + $0x2d4] sm:$0xf0]  ;;  %v1397_v10 = vor.u32 %v1663_v3, %v1396_v0 }
  0x21   :  { %687 = vmatpush.bf16.msra.mxu2 %v1229_v38  ;;  %v1145_v11 = vor.u32 %v1598_v4, %v1142_v5  ;;  %v1614_v12 = vld [vmem:[%s2489_s1 + $0xd4] sm:$0xf]  ;;  %v1206_v13 = vld [vmem:[%s2489_s1 + $0xd8] sm:$0xf0]  ;;  %v1388_v14 = vld [vmem:[%s2489_s1 + $0x240] sm:$0xf]  ;;  %v1461_v18 = vor.u32 %v1679_v9, %v1460_v8 }
  0x22   :  { %700 = vmatpush.bf16.msra.mxu3 %v1293_v39  ;;  %v1661_v15 = vld [vmem:[%s2489_s1 + $0x244] sm:$0xf0]  ;;  %v1596_v16 = vld [vmem:[%s2489_s1 + $0x44] sm:$0xf]  ;;  %v1134_v17 = vld [vmem:[%s2489_s1 + $0x48] sm:$0xf0]  ;;  %v1209_v20 = vor.u32 %v1614_v12, %v1206_v13 }
  0x23   :  { %674 = vmatpush.bf16.msra.mxu1 %v1165_v48  ;;  %662 = vmatmul.bf16.vlgmr.msra.gmra.mxu0 %v2019_v57  ;;  %v1452_v19 = vld [vmem:[%s2489_s1 + $0x2c0] sm:$0xf]  ;;  %v1677_v21 = vld [vmem:[%s2489_s1 + $0x2c4] sm:$0xf0]  ;;  %v1612_v22 = vld [vmem:[%s2489_s1 + $0xc4] sm:$0xf]  ;;  %v1389_v24 = vor.u32 %v1661_v15, %v1388_v14  ;;  %v1137_v25 = vor.u32 %v1596_v16, %v1134_v17 }
  0x24   :  { %706 = vmatpush.bf16.msrb.mxu0 %v1413_v43  ;;  %688 = vmatmul.bf16.vlgmr.msra.gmra.mxu2 %v2017_v52  ;;  %v29_v23 = vld [vmem:[%s2488_s0 + $0x8] sm:$0x3f]  ;;  %v1380_v27 = vld [vmem:[%s2489_s1 + $0x230] sm:$0xf]  ;;  %v1659_v28 = vld [vmem:[%s2489_s1 + $0x234] sm:$0xf0]  ;;  %v1453_v31 = vor.u32 %v1677_v21, %v1452_v19 }
  0x25   :  { %739 = vmatpush.bf16.msrb.mxu2 %v1485_v50  ;;  %701 = vmatmul.bf16.vlgmr.msra.gmra.mxu3 %v2036_v1  ;;  %v1198_v26 = vld [vmem:[%s2489_s1 + $0xc8] sm:$0xf0]  ;;  %34 = vst [vmem:[#allocation1 + $0x20] ss:$4 sm:$0xff] %v29_v23  ;;  %v1594_v29 = vld [vmem:[%s2489_s1 + $0x34] sm:$0xf]  ;;  %v1381_v35 = vor.u32 %v1659_v28, %v1380_v27 }
  0x26   :  { %745 = vmatpush.bf16.msrb.mxu3 %v1161_v44  ;;  %675 = vmatmul.bf16.vlgmr.msra.gmra.mxu1 %v2038_v2  ;;  %v1126_v30 = vld [vmem:[%s2489_s1 + $0x38] sm:$0xf0]  ;;  %v1201_v32 = vor.u32 %v1612_v22, %v1198_v26  ;;  %v1444_v33 = vld [vmem:[%s2489_s1 + $0x2b0] sm:$0xf]  ;;  %v1675_v34 = vld [vmem:[%s2489_s1 + $0x2b4] sm:$0xf0] }
  0x27   :  { %719 = vmatpush.bf16.msrb.mxu1 %v1477_v53  ;;  %v1129_v36 = vor.u32 %v1594_v29, %v1126_v30  ;;  %v1610_v37 = vld [vmem:[%s2489_s1 + $0xb4] sm:$0xf]  ;;  %v1190_v38 = vld [vmem:[%s2489_s1 + $0xb8] sm:$0xf0]  ;;  %v1372_v39 = vld [vmem:[%s2489_s1 + $0x220] sm:$0xf]  ;;  %v1445_v43 = vor.u32 %v1675_v34, %v1444_v33 }
  0x28   :  { %707 = vmatpush.bf16.msrb.mxu0 %v1405_v60  ;;  %v1657_v40 = vld [vmem:[%s2489_s1 + $0x224] sm:$0xf0]  ;;  %v1592_v41 = vld [vmem:[%s2489_s1 + $0x24] sm:$0xf]  ;;  %v1118_v42 = vld [vmem:[%s2489_s1 + $0x28] sm:$0xf0]  ;;  %v1193_v45 = vor.u32 %v1610_v37, %v1190_v38 }
  0x29   :  { %758 = vmatpush.bf16.msra.mxu2 %v1225_v56  ;;  %v1436_v44 = vld [vmem:[%s2489_s1 + $0x2a0] sm:$0xf]  ;;  %v1673_v46 = vld [vmem:[%s2489_s1 + $0x2a4] sm:$0xf0]  ;;  %v1373_v48 = vor.u32 %v1657_v40, %v1372_v39  ;;  %v1121_v49 = vor.u32 %v1592_v41, %v1118_v42  ;;  %v1608_v51 = vld [vmem:[%s2489_s1 + $0xa4] sm:$0xf] }
  0x2a   :  { %746 = vmatpush.bf16.msrb.mxu3 %v1153_v61  ;;  %v1182_v53 = vld [vmem:[%s2489_s1 + $0xa8] sm:$0xf0]  ;;  %v1364_v54 = vld [vmem:[%s2489_s1 + $0x210] sm:$0xf]  ;;  %v1655_v55 = vld [vmem:[%s2489_s1 + $0x214] sm:$0xf0]  ;;  %v1437_v59 = vor.u32 %v1673_v46, %v1436_v44 }
  0x2b   :  { %720 = vmatpush.bf16.msrb.mxu1 %v1469_v6  ;;  %v1590_v56 = vld [vmem:[%s2489_s1 + $0x14] sm:$0xf]  ;;  %v1110_v58 = vld [vmem:[%s2489_s1 + $0x18] sm:$0xf0]  ;;  %v1428_v60 = vld [vmem:[%s2489_s1 + $0x290] sm:$0xf]  ;;  %v1185_v62 = vor.u32 %v1608_v51, %v1182_v53  ;;  %v1365_v4 = vor.u32 %v1655_v55, %v1364_v54 }
  0x2c   :  { %708 = vmatpush.bf16.msrb.mxu0 %v1397_v10  ;;  %v41_v47 = vld.sshfl [vmem:[#allocation1 + $0x30] sm:$0xff pattern:$0x73625140]  ;;  %v1671_v61 = vld [vmem:[%s2489_s1 + $0x294] sm:$0xf0]  ;;  %v1113_v5 = vor.u32 %v1590_v56, %v1110_v58 }
  0x2d   :  { %759 = vmatpush.bf16.msra.mxu2 %v1217_v7  ;;  %v2134_v50 = vpack.c.bf16 %v41_v47, %v41_v47  ;;  %v1606_v63 = vld [vmem:[%s2489_s1 + $0x94] sm:$0xf]  ;;  %v1174_v0 = vld [vmem:[%s2489_s1 + $0x98] sm:$0xf0]  ;;  %v1356_v3 = vld [vmem:[%s2489_s1 + $0x200] sm:$0xf]  ;;  %v1429_v12 = vor.u32 %v1671_v61, %v1428_v60 }
  0x2e   :  { %747 = vmatpush.bf16.msrb.mxu3 %v1145_v11  ;;  %v1653_v6 = vld [vmem:[%s2489_s1 + $0x204] sm:$0xf0]  ;;  %v1588_v7 = vld [vmem:[%s2489_s1 + $0x4] sm:$0xf]  ;;  %v1102_v8 = vld [vmem:[%s2489_s1 + $0x8] sm:$0xf0]  ;;  %v1177_v16 = vor.u32 %v1606_v63, %v1174_v0 }
  0x2f   :  { %721 = vmatpush.bf16.msrb.mxu1 %v1461_v18  ;;  %v1634_v9 = vld [vmem:[%s2489_s1 + $0x174] sm:$0xf]  ;;  %v1286_v10 = vld [vmem:[%s2489_s1 + $0x178] sm:$0xf0]  ;;  %v1420_v14 = vld [vmem:[%s2489_s1 + $0x280] sm:$0xf]  ;;  %v1357_v19 = vor.u32 %v1653_v6, %v1356_v3 }
  0x30   :  { %709 = vmatpush.bf16.msrb.mxu0 %v1389_v24  ;;  %v1666_v11 = vld [vmem:[%s2489_s1 + $0x274] sm:$0xf]  ;;  %v1414_v13 = vld [vmem:[%s2489_s1 + $0x278] sm:$0xf0]  ;;  %v1669_v15 = vld [vmem:[%s2489_s1 + $0x284] sm:$0xf0]  ;;  %v1289_v24 = vor.u32 %v1634_v9, %v1286_v10 }
  0x31   :  { %760 = vmatpush.bf16.msra.mxu2 %v1209_v20  ;;  %v39_v17 = vld.sshfl [vmem:[#allocation1 + $0x20] sm:$0xff pattern:$0x73625140]  ;;  %v1105_v20 = vor.u32 %v1588_v7, %v1102_v8  ;;  %v1166_v21 = vld [vmem:[%s2489_s1 + $0x88] sm:$0xf0]  ;;  %v1421_v29 = vor.u32 %v1669_v15, %v1420_v14 }
  0x32   :  { %748 = vmatpush.bf16.msrb.mxu3 %v1137_v25  ;;  %v1604_v18 = vld [vmem:[%s2489_s1 + $0x84] sm:$0xf]  ;;  %v1650_v22 = vld [vmem:[%s2489_s1 + $0x1f4] sm:$0xf]  ;;  %v1350_v23 = vld [vmem:[%s2489_s1 + $0x1f8] sm:$0xf0]  ;;  %v1417_v25 = vor.u32 %v1666_v11, %v1414_v13 }
  0x33   :  { %722 = vmatpush.bf16.msrb.mxu1 %v1453_v31  ;;  %v1682_v26 = vld [vmem:[%s2489_s1 + $0x2f4] sm:$0xf]  ;;  %v1478_v27 = vld [vmem:[%s2489_s1 + $0x2f8] sm:$0xf0]  ;;  %v1632_v28 = vld [vmem:[%s2489_s1 + $0x164] sm:$0xf]  ;;  %v1169_v33 = vor.u32 %v1604_v18, %v1166_v21 }
  0x34   :  { %710 = vmatpush.bf16.msrb.mxu0 %v1381_v35  ;;  %1490 = vmatmul.msk.bf16.vlgmr.msrb.gmra.mxu2 %vm650_vm0, %v2134_v50  ;;  %v40_v30 = vld.sshfl [vmem:[#allocation1 + $0x28] sm:$0xff pattern:$0x73625140]  ;;  %v1664_v34 = vld [vmem:[%s2489_s1 + $0x264] sm:$0xf]  ;;  %v1481_v37 = vor.u32 %v1682_v26, %v1478_v27 }
  0x35   :  { %761 = vmatpush.bf16.msra.mxu2 %v1201_v32  ;;  %v1278_v31 = vld [vmem:[%s2489_s1 + $0x168] sm:$0xf0]  ;;  %v2222_v32 = vpack.c.bf16 %v39_v17, %v39_v17  ;;  %v1648_v38 = vld [vmem:[%s2489_s1 + $0x1e4] sm:$0xf]  ;;  %v2233_v39 = vpack.c.bf16 %v40_v30, %v40_v30  ;;  %v1270_v46 = vld [vmem:[%s2489_s1 + $0x158] sm:$0xf0] }
  0x36   :  { %749 = vmatpush.bf16.msrb.mxu3 %v1129_v36  ;;  %v1406_v35 = vld [vmem:[%s2489_s1 + $0x268] sm:$0xf0]  ;;  %v1353_v36 = vor.u32 %v1650_v22, %v1350_v23  ;;  %v1281_v40 = vor.u32 %v1632_v28, %v1278_v31  ;;  %v1680_v42 = vld [vmem:[%s2489_s1 + $0x2e4] sm:$0xf]  ;;  %v1662_v47 = vld [vmem:[%s2489_s1 + $0x254] sm:$0xf] }
  0x37   :  { %723 = vmatpush.bf16.msrb.mxu1 %v1445_v43  ;;  %v1342_v41 = vld [vmem:[%s2489_s1 + $0x1e8] sm:$0xf0]  ;;  %v1409_v44 = vor.u32 %v1664_v34, %v1406_v35  ;;  %v1646_v53 = vld [vmem:[%s2489_s1 + $0x1d4] sm:$0xf]  ;;  %v1334_v55 = vld [vmem:[%s2489_s1 + $0x1d8] sm:$0xf0] }
  0x38   :  { %711 = vmatpush.bf16.msrb.mxu0 %v1373_v48  ;;  %v1470_v43 = vld [vmem:[%s2489_s1 + $0x2e8] sm:$0xf0]  ;;  %v1398_v48 = vld [vmem:[%s2489_s1 + $0x258] sm:$0xf0]  ;;  %v1678_v56 = vld [vmem:[%s2489_s1 + $0x2d4] sm:$0xf] }
  0x39   :  { %762 = vmatpush.bf16.msra.mxu2 %v1193_v45  ;;  %v1630_v45 = vld [vmem:[%s2489_s1 + $0x154] sm:$0xf]  ;;  %v1473_v51 = vor.u32 %v1680_v42, %v1470_v43  ;;  %v1462_v58 = vld [vmem:[%s2489_s1 + $0x2d8] sm:$0xf0]  ;;  %v1628_v60 = vld [vmem:[%s2489_s1 + $0x144] sm:$0xf] }
  0x3a   :  { %750 = vmatpush.bf16.msrb.mxu3 %v1121_v49  ;;  %v1345_v49 = vor.u32 %v1648_v38, %v1342_v41  ;;  %v1273_v54 = vor.u32 %v1630_v45, %v1270_v46  ;;  %v1262_v61 = vld [vmem:[%s2489_s1 + $0x148] sm:$0xf0]  ;;  %v1465_v0 = vor.u32 %v1678_v56, %v1462_v58  ;;  %v1644_v3 = vld [vmem:[%s2489_s1 + $0x1c4] sm:$0xf]  ;;  %v1626_v7 = vld [vmem:[%s2489_s1 + $0x134] sm:$0xf] }
  0x3b   :  { %724 = vmatpush.bf16.msrb.mxu1 %v1437_v59  ;;  %v1401_v59 = vor.u32 %v1662_v47, %v1398_v48  ;;  %v1390_v63 = vld [vmem:[%s2489_s1 + $0x248] sm:$0xf0]  ;;  %v1265_v6 = vor.u32 %v1628_v60, %v1262_v61  ;;  %v1254_v9 = vld [vmem:[%s2489_s1 + $0x138] sm:$0xf0] }
  0x3c   :  { %712 = vmatpush.bf16.msrb.mxu0 %v1365_v4  ;;  %v1326_v4 = vld [vmem:[%s2489_s1 + $0x1c8] sm:$0xf0] }
  0x3d   :  { %763 = vmatpush.bf16.msra.mxu2 %v1185_v62  ;;  %v1660_v62 = vld [vmem:[%s2489_s1 + $0x244] sm:$0xf] }
  0x3e   :  { %751 = vmatpush.bf16.msrb.mxu3 %v1113_v5  ;;  %v1676_v5 = vld [vmem:[%s2489_s1 + $0x2c4] sm:$0xf]  ;;  %v1393_v8 = vor.u32 %v1660_v62, %v1390_v63 }
  0x3f   :  { %725 = vmatpush.bf16.msrb.mxu1 %v1429_v12 }
  0x40   :  { %713 = vmatpush.bf16.msrb.mxu0 %v1357_v19 }
  0x41   :  { %764 = vmatpush.bf16.msra.mxu2 %v1177_v16 }
  0x42   :  { %752 = vmatpush.bf16.msrb.mxu3 %v1105_v20 }
  0x43   :  { %726 = vmatpush.bf16.msrb.mxu1 %v1421_v29  ;;  %714 = vmatmul.bf16.vlgmr.msrb.gmra.mxu0 %v2222_v32 }
  0x44   :  { %771 = vmatpush.bf16.msra.mxu0 %v1289_v24 }
  0x45   :  { %765 = vmatpush.bf16.msra.mxu2 %v1169_v33  ;;  %753 = vmatmul.bf16.vlgmr.msrb.gmra.mxu3 %v2019_v57  ;;  %v1454_v57 = vld [vmem:[%s2489_s1 + $0x2c8] sm:$0xf0] }
  0x46   :  { %797 = vmatpush.bf16.msra.mxu3 %v1417_v25  ;;  %727 = vmatmul.bf16.vlgmr.msrb.gmra.mxu1 %v2233_v39 }
  0x47   :  { %784 = vmatpush.bf16.msra.mxu1 %v1353_v36 }
  0x48   :  { %772 = vmatpush.bf16.msra.mxu0 %v1281_v40  ;;  %766 = vmatmul.bf16.vlgmr.msra.gmra.mxu2 %v2038_v2  ;;  %v1337_v2 = vor.u32 %v1646_v53, %v1334_v55 }
  0x49   :  { %810 = vmatpush.bf16.msrb.mxu2 %v1481_v37 }
  0x4a   :  { %798 = vmatpush.bf16.msra.mxu3 %v1409_v44 }
  0x4b   :  { %785 = vmatpush.bf16.msra.mxu1 %v1345_v49 }
  0x4c   :  { %773 = vmatpush.bf16.msra.mxu0 %v1273_v54 }
  0x4d   :  { %811 = vmatpush.bf16.msrb.mxu2 %v1473_v51 }
  0x4e   :  { %799 = vmatpush.bf16.msra.mxu3 %v1401_v59 }
  0x4f   :  { %12 = vsyncpa [#allocation3], 0  ;;  %v1658_v10 = vld [vmem:[%s2489_s1 + $0x234] sm:$0xf]  ;;  %v1382_v11 = vld [vmem:[%s2489_s1 + $0x238] sm:$0xf0]  ;;  %786 = vmatpush.bf16.msra.mxu1 %v1337_v2  ;;  %v1329_v12 = vor.u32 %v1644_v3, %v1326_v4  ;;  %v1457_v13 = vor.u32 %v1676_v5, %v1454_v57  ;;  %v1257_v15 = vor.u32 %v1626_v7, %v1254_v9 }
  0x50   :  { %v1642_v14 = vld [vmem:[%s2489_s1 + $0x1b4] sm:$0xf]  ;;  %774 = vmatpush.bf16.msra.mxu0 %v1265_v6  ;;  %v1318_v16 = vld [vmem:[%s2489_s1 + $0x1b8] sm:$0xf0]  ;;  %v1385_v19 = vor.u32 %v1658_v10, %v1382_v11  ;;  %v1624_v20 = vld [vmem:[%s2489_s1 + $0x124] sm:$0xf] }
  0x51   :  { %812 = vmatpush.bf16.msrb.mxu2 %v1465_v0  ;;  %v1674_v17 = vld [vmem:[%s2489_s1 + $0x2b4] sm:$0xf]  ;;  %v1446_v18 = vld [vmem:[%s2489_s1 + $0x2b8] sm:$0xf0]  ;;  %v1246_v21 = vld [vmem:[%s2489_s1 + $0x128] sm:$0xf0]  ;;  %v1321_v24 = vor.u32 %v1642_v14, %v1318_v16 }
  0x52   :  { %800 = vmatpush.bf16.msra.mxu3 %v1393_v8  ;;  %v1656_v22 = vld [vmem:[%s2489_s1 + $0x224] sm:$0xf]  ;;  %v1374_v23 = vld [vmem:[%s2489_s1 + $0x228] sm:$0xf0]  ;;  %v1449_v25 = vor.u32 %v1674_v17, %v1446_v18  ;;  %v1249_v27 = vor.u32 %v1624_v20, %v1246_v21  ;;  %v1622_v33 = vld [vmem:[%s2489_s1 + $0x114] sm:$0xf] }
  0x53   :  { %787 = vmatpush.bf16.msra.mxu1 %v1329_v12  ;;  %v1640_v26 = vld [vmem:[%s2489_s1 + $0x1a4] sm:$0xf]  ;;  %v1310_v28 = vld [vmem:[%s2489_s1 + $0x1a8] sm:$0xf0]  ;;  %v1377_v31 = vor.u32 %v1656_v22, %v1374_v23  ;;  %v1238_v34 = vld [vmem:[%s2489_s1 + $0x118] sm:$0xf0] }
  0x54   :  { %775 = vmatpush.bf16.msra.mxu0 %v1257_v15  ;;  %v1672_v29 = vld [vmem:[%s2489_s1 + $0x2a4] sm:$0xf]  ;;  %v1438_v30 = vld [vmem:[%s2489_s1 + $0x2a8] sm:$0xf0]  ;;  %v1654_v35 = vld [vmem:[%s2489_s1 + $0x214] sm:$0xf]  ;;  %v1313_v37 = vor.u32 %v1640_v26, %v1310_v28  ;;  %v1241_v41 = vor.u32 %v1622_v33, %v1238_v34 }
  0x55   :  { %813 = vmatpush.bf16.msrb.mxu2 %v1457_v13  ;;  %v1366_v36 = vld [vmem:[%s2489_s1 + $0x218] sm:$0xf0]  ;;  %v1441_v38 = vor.u32 %v1672_v29, %v1438_v30  ;;  %v1638_v40 = vld [vmem:[%s2489_s1 + $0x194] sm:$0xf]  ;;  %v1620_v46 = vld [vmem:[%s2489_s1 + $0x104] sm:$0xf] }
  0x56   :  { %801 = vmatpush.bf16.msra.mxu3 %v1385_v19  ;;  %v1302_v42 = vld [vmem:[%s2489_s1 + $0x198] sm:$0xf0]  ;;  %v1670_v43 = vld [vmem:[%s2489_s1 + $0x294] sm:$0xf]  ;;  %v1369_v45 = vor.u32 %v1654_v35, %v1366_v36  ;;  %v1230_v47 = vld [vmem:[%s2489_s1 + $0x108] sm:$0xf0] }
  0x57   :  { %788 = vmatpush.bf16.msra.mxu1 %v1321_v24  ;;  %v1430_v44 = vld [vmem:[%s2489_s1 + $0x298] sm:$0xf0]  ;;  %v1652_v48 = vld [vmem:[%s2489_s1 + $0x204] sm:$0xf]  ;;  %v1358_v49 = vld [vmem:[%s2489_s1 + $0x208] sm:$0xf0]  ;;  %v1305_v51 = vor.u32 %v1638_v40, %v1302_v42  ;;  %v1233_v54 = vor.u32 %v1620_v46, %v1230_v47 }
  0x58   :  { %776 = vmatpush.bf16.msra.mxu0 %v1249_v27  ;;  %v1433_v53 = vor.u32 %v1670_v43, %v1430_v44  ;;  %v1636_v55 = vld [vmem:[%s2489_s1 + $0x184] sm:$0xf]  ;;  %v1294_v56 = vld [vmem:[%s2489_s1 + $0x188] sm:$0xf0]  ;;  %v1361_v58 = vor.u32 %v1652_v48, %v1358_v49  ;;  %v1693_v3 = vld [vmem:[%s2491_s3 + $0x38] sm:$0xff]  ;;  %s1739_s21 = smov [#allocation2]  }
  0x59   :  { %814 = vmatpush.bf16.msrb.mxu2 %v1449_v25  ;;  %v1668_v59 = vld [vmem:[%s2489_s1 + $0x284] sm:$0xf]  ;;  %v1422_v60 = vld [vmem:[%s2489_s1 + $0x288] sm:$0xf0]  ;;  %v1297_v63 = vor.u32 %v1636_v55, %v1294_v56  ;;  %v154_v8 = vld [vmem:[%s2490_s2] sm:$0x3] }
  0x5a   :  { %802 = vmatpush.bf16.msra.mxu3 %v1377_v31  ;;  %v1684_v61 = vld [vmem:[%s2489_s1 + $0x304] sm:$0xf]  ;;  %v1486_v62 = vld [vmem:[%s2489_s1 + $0x308] sm:$0xf0]  ;;  %v1425_v2 = vor.u32 %v1668_v59, %v1422_v60  ;;  %v156_v12 = vperm.slane %v154_v8, 0  ;;  %v1701_v19 = vld [vmem:[%s2491_s3 + $0x78] sm:$0xff] }
  0x5b   :  { %789 = vmatpush.bf16.msra.mxu1 %v1313_v37  ;;  %v1489_v0 = vor.u32 %v1684_v61, %v1486_v62  ;;  %v1687_v4 = vld [vmem:[%s2491_s3 + $0x8] sm:$0xff]  ;;  %v1686_v57 = vld [vmem:[%s2491_s3] sm:$0xff]  ;;  %v1700_v24 = vld [vmem:[%s2491_s3 + $0x70] sm:$0xff]  ;;  %v157_v46 = vperm.slane %v154_v8, 1  ;;  %s1087_s22 = sshll.u32 %s1739_s21, 4  ;;  %s1089_s23 = sshll.u32 %s2495_s7, 4  ;;  %s1088_s22 = int_to_ptr.vmem [resolvable:$true] %s1087_s22  ;;  %s1090_s23 = int_to_ptr.hbm [resolvable:$true] %s1089_s23 }
  0x5c   :  { %777 = vmatpush.bf16.msra.mxu0 %v1241_v41  ;;  %v1699_v28 = vld [vmem:[%s2491_s3 + $0x68] sm:$0xff]  ;;  %v1698_v31 = vld [vmem:[%s2491_s3 + $0x60] sm:$0xff]  ;;  %v1697_v37 = vld [vmem:[%s2491_s3 + $0x58] sm:$0xff] }
  0x5d   :  { %815 = vmatpush.bf16.msrb.mxu2 %v1441_v38  ;;  %v1696_v38 = vld [vmem:[%s2491_s3 + $0x50] sm:$0xff]  ;;  %v1695_v42 = vld [vmem:[%s2491_s3 + $0x48] sm:$0xff]  ;;  %v1694_v43 = vld [vmem:[%s2491_s3 + $0x40] sm:$0xff] }
  0x5e   :  { %803 = vmatpush.bf16.msra.mxu3 %v1369_v45  ;;  %v1711_v8 = vld [vmem:[%s2492_s4] ss:$0 sm:$0xff] }
  0x5f   :  { %790 = vmatpush.bf16.msra.mxu1 %v1305_v51 }
  0x60   :  { %778 = vmatpush.bf16.msra.mxu0 %v1233_v54 }
  0x61   :  { %816 = vmatpush.bf16.msrb.mxu2 %v1433_v53 }
  0x62   :  { %804 = vmatpush.bf16.msra.mxu3 %v1361_v58 }
  0x63   :  { %791 = vmatpush.bf16.msra.mxu1 %v1297_v63  ;;  %779 = vmatmul.bf16.vlgmr.msra.gmra.mxu0 %v2017_v52  ;;  %v1692_v52 = vld [vmem:[%s2491_s3 + $0x30] sm:$0xff] }
  0x65   :  { %805 = vmatmul.bf16.vlgmr.msra.gmra.mxu3 %v2222_v32  ;;  %817 = vmatpush.bf16.msrb.mxu2 %v1425_v2  ;;  %v1691_v32 = vld [vmem:[%s2491_s3 + $0x28] sm:$0xff] }
  0x66   :  { %792 = vmatmul.bf16.vlgmr.msra.gmra.mxu1 %v2036_v1  ;;  %v1690_v1 = vld [vmem:[%s2491_s3 + $0x20] sm:$0xff]  ;;  %985 = vmatpush.bf16.msrb.mxu3 %v1701_v19 }
  0x67   :  { %972 = vmatpush.bf16.msrb.mxu1 %v1693_v3 }
  0x68   :  { %818 = vmatmul.bf16.vlgmr.msrb.gmra.mxu2 %v2233_v39  ;;  %v1688_v39 = vld [vmem:[%s2491_s3 + $0x10] sm:$0xff] }
  0x69   :  { %830 = vmatpush.bf16.msra.mxu2 %v1489_v0 }
  0x6a   :  { %986 = vmatpush.bf16.msrb.mxu3 %v1700_v24 }
  0x6b   :  { %973 = vmatpush.bf16.msrb.mxu1 %v1692_v52  ;;  %v1709_v52 = vld [vmem:[%s2493_s5 + $0x38] sm:$0xff] }
  0x6c   :  { %1068 = vmatpush.bf16.msrb.mxu0 %v1709_v52 }
  0x6e   :  { %987 = vmatpush.bf16.msrb.mxu3 %v1699_v28 }
  0x6f   :  { %974 = vmatpush.bf16.msrb.mxu1 %v1691_v32  ;;  %v1708_v32 = vld [vmem:[%s2493_s5 + $0x30] sm:$0xff] }
  0x70   :  { %1069 = vmatpush.bf16.msrb.mxu0 %v1708_v32 }
  0x72   :  { %988 = vmatpush.bf16.msrb.mxu3 %v1698_v31 }
  0x73   :  { %975 = vmatpush.bf16.msrb.mxu1 %v1690_v1  ;;  %v1707_v1 = vld [vmem:[%s2493_s5 + $0x28] sm:$0xff] }
  0x74   :  { %1070 = vmatpush.bf16.msrb.mxu0 %v1707_v1 }
  0x76   :  { %989 = vmatpush.bf16.msrb.mxu3 %v1697_v37 }
  0x78   :  { %1491 = vmatmul.msk.bf16.vlgmr.msra.gmra.mxu2 %vm650_vm0, %v2134_v50  ;;  %v1689_v50 = vld [vmem:[%s2491_s3 + $0x18] sm:$0xff] }
  0x79   :  { %976 = vmatpush.bf16.msrb.mxu1 %v1689_v50  ;;  %v1706_v50 = vld [vmem:[%s2493_s5 + $0x20] sm:$0xff] }
  0x7a   :  { %990 = vmatpush.bf16.msrb.mxu3 %v1696_v38  ;;  %1071 = vmatpush.bf16.msrb.mxu0 %v1706_v50 }
  0x7d   :  { %977 = vmatpush.bf16.msrb.mxu1 %v1688_v39  ;;  %v1705_v39 = vld [vmem:[%s2493_s5 + $0x18] sm:$0xff] }
  0x7e   :  { %991 = vmatpush.bf16.msrb.mxu3 %v1695_v42  ;;  %1072 = vmatpush.bf16.msrb.mxu0 %v1705_v39 }
  0x81   :  { %978 = vmatpush.bf16.msrb.mxu1 %v1687_v4  ;;  %v1704_v4 = vld [vmem:[%s2493_s5 + $0x10] sm:$0xff] }
  0x82   :  { %992 = vmatpush.bf16.msrb.mxu3 %v1694_v43  ;;  %1073 = vmatpush.bf16.msrb.mxu0 %v1704_v4 }
  0x85   :  { %979 = vmatpush.bf16.msrb.mxu1 %v1686_v57  ;;  %v1703_v57 = vld [vmem:[%s2493_s5 + $0x8] sm:$0xff] }
  0x86   :  { %1074 = vmatpush.bf16.msrb.mxu0 %v1703_v57 }
  0xa0   :  { %v663_v5 = vpop.f32.mrf.mxu0 }
  0xa1   :  { %v664_v14 = vadd.f32 %v663_v5, %v156_v12 }
  0xa3   :  { %v676_v6 = vpop.f32.mrf.mxu1 }
  0xa4   :  { %v677_v16 = vadd.f32 %v676_v6, %v664_v14 }
  0xa7   :  { %v689_v7 = vpop.f32.mrf.mxu2 }
  0xa8   :  { %v702_v9 = vpop.f32.mrf.mxu3  ;;  %v665_v10 = vpop.f32.mrf.mxu0  ;;  %v690_v18 = vadd.f32 %v689_v7, %v677_v16  ;;  %v1702_v7 = vld [vmem:[%s2493_s5] sm:$0xff] }
  0xa9   :  { %1075 = vmatpush.bf16.msrb.mxu0 %v1702_v7 }
  0xaa   :  { %v703_v20 = vadd.f32 %v702_v9, %v690_v18 }
  0xab   :  { %v678_v11 = vpop.f32.mrf.mxu1 }
  0xaf   :  { %v691_v13 = vpop.f32.mrf.mxu2 }
  0xb0   :  { %v704_v15 = vpop.f32.mrf.mxu3 }
  0xb1   :  { %v1712_v15 = vld [vmem:[%s2494_s6] ss:$0 sm:$0xff] }
  0xb7   :  { %v741_v17 = vpop.f32.mrf.mxu2 }
  0xbf   :  { %v743_v23 = vpop.f32.mrf.mxu2 }
  0xc0   :  { %v715_v21 = vpop.f32.mrf.mxu0 }
  0xc1   :  { %v716_v22 = vadd.f32 %v715_v21, %v703_v20 }
  0xc3   :  { %v728_v25 = vpop.f32.mrf.mxu1 }
  0xc4   :  { %v729_v26 = vadd.f32 %v728_v25, %v716_v22 }
  0xc6   :  { %v742_v27 = vadd.f32 %v741_v17, %v729_v26 }
  0xc8   :  { %v836_v29 = vmax.f32 %v742_v27, 0.0  ;;  %v717_v30 = vpop.f32.mrf.mxu0  ;;  %v754_v35 = vpop.f32.mrf.mxu3 }
  0xc9   :  { %v755_v49 = vadd.f32 %v754_v35, %v157_v46 }
  0xca   :  { %v838_v33 = vpack.c.bf16 %v836_v29, %v836_v29 }
  0xcb   :  { %v767_v34 = vpop.f32.mrf.mxu2  ;;  %v730_v36 = vpop.f32.mrf.mxu1 }
  0xcc   :  { %980 = vmatmul.bf16.vlgmr.msrb.gmra.mxu1 %v838_v33  ;;  %v768_v54 = vadd.f32 %v767_v34, %v755_v49 }
  0xd0   :  { %v756_v41 = vpop.f32.mrf.mxu3 }
  0xd3   :  { %v769_v40 = vpop.f32.mrf.mxu2 }
  0xe0   :  { %v780_v44 = vpop.f32.mrf.mxu0 }
  0xe1   :  { %v781_v55 = vadd.f32 %v780_v44, %v768_v54 }
  0xe3   :  { %v793_v45 = vpop.f32.mrf.mxu1 }
  0xe4   :  { %v794_v59 = vadd.f32 %v793_v45, %v781_v55 }
  0xe8   :  { %v806_v47 = vpop.f32.mrf.mxu3  ;;  %v782_v48 = vpop.f32.mrf.mxu0 }
  0xe9   :  { %v807_v60 = vadd.f32 %v806_v47, %v794_v59 }
  0xeb   :  { %v819_v51 = vpop.f32.mrf.mxu2  ;;  %v795_v53 = vpop.f32.mrf.mxu1 }
  0xec   :  { %v820_v61 = vadd.f32 %v819_v51, %v807_v60 }
  0xf0   :  { %v808_v56 = vpop.f32.mrf.mxu3 }
  0xf3   :  { %v821_v58 = vpop.f32.mrf.mxu2 }
  0xfb   :  { %v832_v62 = vpop.f32.mrf.mxu2 }
  0xfc   :  { %v833_v63 = vadd.f32 %v832_v62, %v820_v61 }
  0xfe   :  { %v837_v2 = vmax.f32 %v833_v63, 0.0 }
 0x100   :  { %v839_v0 = vpack.c.bf16 %v837_v2, %v837_v2 }
 0x102   :  { %993 = vmatmul.bf16.vlgmr.msrb.gmra.mxu3 %v839_v0 }
 0x103   :  { %v834_v3 = vpop.f32.mrf.mxu2 }
 0x149   :  { %v981_v5 = vpop.f32.mrf.mxu1 }
 0x14a   :  { %v982_v9 = vadd.f32 %v1711_v8, %v981_v5 }
 0x151   :  { %v983_v6 = vpop.f32.mrf.mxu1 }
 0x185   :  { %v994_v10 = vpop.f32.mrf.mxu3 }
 0x186   :  { %v995_v11 = vadd.f32 %v994_v10, %v982_v9 }
 0x188   :  { %v998_v12 = vmax.f32 %v995_v11, 0.0 }
 0x18a   :  { %v999_v13 = vpack.c.bf16 %v998_v12, %v998_v12 }
 0x18c   :  { %1076 = vmatmul.bf16.vlgmr.msrb.gmra.mxu0 %v999_v13 }
 0x18d   :  { %v996_v14 = vpop.f32.mrf.mxu3 }
 0x209   :  { %v1077_v16 = vpop.f32.mrf.mxu0 }
 0x20a   :  { %v1078_v17 = vadd.f32 %v1712_v15, %v1077_v16 }
 0x20c   :  { %1081 = vst [vmem:[#allocation2] sm:$0x3] %v1078_v17 }
 0x20d   :  { %1092 = dma.vmem_to_hbm [thread:$0]  %s1088_s22, 32, %s1090_s23, [#allocation3]  }
 0x211   :  { %v1079_v18 = vpop.f32.mrf.mxu0 }
 0x212   :  { %1737 = dma.done.wait [#allocation3], 32  }
 0x213   :  { %1738 = vsyncadd [#allocation3], 4294967264 }
 0x214   :  { %1097 = vsyncpa [#allocation3], 1 }

</bundles_post_ra>
